<compile_context>
chip_gen: v5e
topology: v5e:2x2
jax: 0.10.0
libtpu: 0.0.40
codegen_flags: <defaults>
</compile_context>

<pallas_src>
import functools

import jax
import jax.numpy as jnp
from jax.experimental import pallas as pl
from jax.experimental.pallas import tpu as pltpu

_EPS = 1e-6  # PyTorch TripletMarginLoss default eps


def _round_up(x, m):
    return (x + m - 1) // m * m


def _vmem_budget():
    """(bytes usable for tile sizing, scoped vmem limit to request)."""
    try:
        capacity = int(pltpu.get_tpu_info().vmem_capacity_bytes)
    except Exception:
        capacity = 64 * 1024 * 1024  # conservative fallback = v7x per-TC VMEM
    budget = int(capacity * 0.55)    # what the tile-size heuristic may consume
    limit = int(capacity * 0.75)     # scoped limit handed to the compiler
    return budget, limit


def _pick_tile_n(d, itemsize, vmem_budget):
    """Largest sublane tile that keeps (3 double-buffered native-dtype inputs
    + ~5 live f32 intermediates: a/p/n upcasts and the two diff temporaries)
    under the VMEM budget.  No artificial small cap: bigger tiles amortize the
    ~0.35 us per-grid-step overhead."""
    d_lanes = max(_round_up(d, 128), 128)                 # lane padding
    per_row_bytes = 3 * 2 * d_lanes * itemsize + 5 * d_lanes * 4
    cap = vmem_budget // per_row_bytes
    return max(8, min(8192, (cap // 8) * 8))


def _triplet_kernel(margin_ref, a_ref, p_ref, n_ref, o_ref, *,
                    tile_n, batch, needs_mask):
    """One (tile_n, D) tile -> per-tile partial hinge sum (lane-dense block)."""
    i = pl.program_id(0)

    # Upcast in-VMEM (inputs may be bf16); all math in f32.
    a = a_ref[...].astype(jnp.float32)
    p = p_ref[...].astype(jnp.float32)
    n = n_ref[...].astype(jnp.float32)

    # PyTorch pairwise_distance adds eps to the element-wise diff before norm.
    diff_ap = a - p + _EPS
    diff_an = a - n + _EPS
    d_ap = jnp.sqrt(jnp.sum(diff_ap * diff_ap, axis=-1, keepdims=True))  # (tile_n, 1)
    d_an = jnp.sqrt(jnp.sum(diff_an * diff_an, axis=-1, keepdims=True))  # (tile_n, 1)

    margin = margin_ref[0, 0]
    per_sample = jnp.maximum(d_ap - d_an + margin, 0.0)                  # (tile_n, 1)

    # Unmasked partial sum for every tile (lane-dense (1, 8, 128) block).
    o_ref[...] = jnp.full((1, 8, 128), jnp.sum(per_sample), dtype=jnp.float32)

    if needs_mask:
        # Only the last tile has rows past the true batch; re-write it masked.
        # Mask is a select applied AFTER the distance math, so garbage (even
        # NaN/Inf) in the out-of-bounds rows is safely discarded.
        @pl.when(i == pl.num_programs(0) - 1)
        def _():
            row = jax.lax.broadcasted_iota(jnp.int32, (tile_n, 1), 0) + i * tile_n
            masked = jnp.where(row < batch, per_sample, 0.0)
            o_ref[...] = jnp.full((1, 8, 128), jnp.sum(masked), dtype=jnp.float32)


def dynamic_triplet_loss(anchor, positive, negative, current_epoch,
                         initial_margin=0.5, max_margin=2.0, epochs=100,
                         tile_n=None):
    """JAX/Pallas equivalent of DynamicTripletLoss.forward (returns scalar loss)."""
    assert anchor.shape == positive.shape == negative.shape
    n, d = anchor.shape

    # update_margin (pure scalar glue, stays in plain JAX).
    margin = initial_margin + (max_margin - initial_margin) * (
        jnp.float32(current_epoch) / jnp.float32(epochs))
    margin = jnp.reshape(margin, (1, 1)).astype(jnp.float32)

    vmem_budget, vmem_limit = _vmem_budget()
    if tile_n is None:
        tile_n = _pick_tile_n(d, anchor.dtype.itemsize, vmem_budget)
    tile_n = max(8, _round_up(tile_n, 8))
    tile_n = min(tile_n, _round_up(n, 8))

    n_tiles = pl.cdiv(n, tile_n)
    needs_mask = (n % tile_n) != 0

    kernel = functools.partial(_triplet_kernel, tile_n=tile_n, batch=n,
                               needs_mask=needs_mask)

    partials = pl.pallas_call(
        kernel,
        out_shape=jax.ShapeDtypeStruct((n_tiles, 8, 128), jnp.float32),
        grid_spec=pltpu.PrefetchScalarGridSpec(
            num_scalar_prefetch=0,
            grid=(n_tiles,),
            in_specs=[
                pl.BlockSpec(memory_space=pltpu.SMEM),          # margin scalar
                pl.BlockSpec((tile_n, d), lambda i: (i, 0)),    # anchor
                pl.BlockSpec((tile_n, d), lambda i: (i, 0)),    # positive
                pl.BlockSpec((tile_n, d), lambda i: (i, 0)),    # negative
            ],
            out_specs=pl.BlockSpec((1, 8, 128), lambda i: (i, 0, 0)),
        ),
        compiler_params=pltpu.CompilerParams(
            dimension_semantics=("parallel",),     # independent per-tile sums
            vmem_limit_bytes=vmem_limit),
    )(margin, anchor, positive, negative)

    # Finish the mean in the wrapper (tiny: n_tiles scalars).
    return jnp.sum(partials[:, 0, 0]) / jnp.float32(n)


if __name__ == "__main__":
    key = jax.random.PRNGKey(0)
    k_a, k_p, k_n = jax.random.split(key, 3)

    N, D = 20, 32  # small embedding batch (non-multiple of 8 -> exercises masking)
    anchor = jax.random.normal(k_a, (N, D), dtype=jnp.float32)
    positive = jax.random.normal(k_p, (N, D), dtype=jnp.float32)
    negative = jax.random.normal(k_n, (N, D), dtype=jnp.float32)
    current_epoch = 10

    # Pure-JAX reference of the same semantics.
    margin_ref = 0.5 + (2.0 - 0.5) * (current_epoch / 100.0)
    d_ap = jnp.linalg.norm(anchor - positive + 1e-6, axis=-1)
    d_an = jnp.linalg.norm(anchor - negative + 1e-6, axis=-1)
    ref = jnp.mean(jnp.maximum(d_ap - d_an + margin_ref, 0.0))

    # Default tiling (single ragged tile at this size).
    loss = dynamic_triplet_loss(anchor, positive, negative, current_epoch,
                                initial_margin=0.5, max_margin=2.0, epochs=100)
    jax.block_until_ready(loss)
    assert jnp.allclose(loss, ref, atol=1e-5, rtol=1e-5), (loss, ref)

    # Forced multi-tile grid with a ragged last tile (no padding; masked in-kernel).
    loss_tiled = dynamic_triplet_loss(anchor, positive, negative, current_epoch,
                                      tile_n=8)
    jax.block_until_ready(loss_tiled)
    assert jnp.allclose(loss_tiled, ref, atol=1e-5, rtol=1e-5), (loss_tiled, ref)

    # Exact-multiple batch (no mask traced at all).
    loss_even = dynamic_triplet_loss(anchor[:16], positive[:16], negative[:16],
                                     current_epoch, tile_n=8)
    jax.block_until_ready(loss_even)
    ref_even = jnp.mean(jnp.maximum(d_ap[:16] - d_an[:16] + margin_ref, 0.0))
    assert jnp.allclose(loss_even, ref_even, atol=1e-5, rtol=1e-5), (loss_even, ref_even)

    # bf16 inputs stream natively; upcast happens inside the kernel.
    loss_bf16 = dynamic_triplet_loss(anchor.astype(jnp.bfloat16),
                                     positive.astype(jnp.bfloat16),
                                     negative.astype(jnp.bfloat16),
                                     current_epoch, tile_n=8)
    jax.block_until_ready(loss_bf16)
    assert jnp.allclose(loss_bf16, ref, atol=5e-2, rtol=5e-2), (loss_bf16, ref)

    print("KERNEL_OK")
</pallas_src>

<mosaic_0001>
module attributes {stable_mosaic.version = 11 : i64} {
  func.func @_triplet_kernel(%arg0: i32, %arg1: memref<1x1xf32, #tpu.memory_space<smem>>, %arg2: memref<24x32xf32, #tpu.memory_space<vmem>>, %arg3: memref<24x32xf32, #tpu.memory_space<vmem>>, %arg4: memref<24x32xf32, #tpu.memory_space<vmem>>, %arg5: memref<1x8x128xf32, #tpu.memory_space<vmem>>) attributes {dimension_semantics = [#tpu.dimension_semantics<parallel>], iteration_bounds = array<i64: 1>, scalar_prefetch = 0 : i64, scratch_operands = 0 : i64, tpu.core_type = #tpu.core_type<tc>, window_params = [{transform_indices = @transform_0, window_bounds = array<i64: 1, 1>}, {transform_indices = @transform_1, window_bounds = array<i64: 24, 32>}, {transform_indices = @transform_2, window_bounds = array<i64: 24, 32>}, {transform_indices = @transform_3, window_bounds = array<i64: 24, 32>}, {transform_indices = @transform_4, window_bounds = array<i64: 1, 8, 128>}]} {
    %c0 = arith.constant 0 : index
    %c0_0 = arith.constant 0 : index
    %0 = vector.load %arg2[%c0, %c0_0] : memref<24x32xf32, #tpu.memory_space<vmem>>, vector<24x32xf32>
    %c0_1 = arith.constant 0 : index
    %c0_2 = arith.constant 0 : index
    %1 = vector.load %arg3[%c0_1, %c0_2] : memref<24x32xf32, #tpu.memory_space<vmem>>, vector<24x32xf32>
    %c0_3 = arith.constant 0 : index
    %c0_4 = arith.constant 0 : index
    %2 = vector.load %arg4[%c0_3, %c0_4] : memref<24x32xf32, #tpu.memory_space<vmem>>, vector<24x32xf32>
    %3 = arith.subf %0, %1 : vector<24x32xf32>
    %cst = arith.constant 9.99999997E-7 : f32
    %4 = vector.broadcast %cst : f32 to vector<24x32xf32>
    %5 = arith.addf %3, %4 : vector<24x32xf32>
    %6 = arith.subf %0, %2 : vector<24x32xf32>
    %cst_5 = arith.constant 9.99999997E-7 : f32
    %7 = vector.broadcast %cst_5 : f32 to vector<24x32xf32>
    %8 = arith.addf %6, %7 : vector<24x32xf32>
    %9 = arith.mulf %5, %5 : vector<24x32xf32>
    %cst_6 = arith.constant dense<0.000000e+00> : vector<24xf32>
    %10 = vector.multi_reduction <add>, %9, %cst_6 [1] : vector<24x32xf32> to vector<24xf32>
    %11 = vector.shape_cast %10 : vector<24xf32> to vector<24x1xf32>
    %12 = math.sqrt %11 : vector<24x1xf32>
    %13 = arith.mulf %8, %8 : vector<24x32xf32>
    %cst_7 = arith.constant dense<0.000000e+00> : vector<24xf32>
    %14 = vector.multi_reduction <add>, %13, %cst_7 [1] : vector<24x32xf32> to vector<24xf32>
    %15 = vector.shape_cast %14 : vector<24xf32> to vector<24x1xf32>
    %16 = math.sqrt %15 : vector<24x1xf32>
    %c0_8 = arith.constant 0 : index
    %c0_9 = arith.constant 0 : index
    %17 = memref.load %arg1[%c0_8, %c0_9] : memref<1x1xf32, #tpu.memory_space<smem>>
    %18 = arith.subf %12, %16 : vector<24x1xf32>
    %19 = vector.broadcast %17 : f32 to vector<24x1xf32>
    %20 = arith.addf %18, %19 : vector<24x1xf32>
    %cst_10 = arith.constant 0.000000e+00 : f32
    %21 = vector.broadcast %cst_10 : f32 to vector<24x1xf32>
    %22 = arith.maximumf %20, %21 : vector<24x1xf32>
    %23 = vector.shape_cast %22 : vector<24x1xf32> to vector<1x24x1xf32>
    %cst_11 = arith.constant dense<0.000000e+00> : vector<1xf32>
    %24 = vector.multi_reduction <add>, %23, %cst_11 [1, 2] : vector<1x24x1xf32> to vector<1xf32>
    %25 = vector.shape_cast %24 : vector<1xf32> to vector<1x1x1xf32>
    %26 = vector.extract %25[0, 0, 0] : f32 from vector<1x1x1xf32>
    %27 = vector.broadcast %26 : f32 to vector<1x8x128xf32>
    %c0_12 = arith.constant 0 : index
    %c0_13 = arith.constant 0 : index
    %c0_14 = arith.constant 0 : index
    %28 = vector.load %arg5[%c0_12, %c0_13, %c0_14] : memref<1x8x128xf32, #tpu.memory_space<vmem>>, vector<1x8x128xf32>
    tpu.vector_store %arg5[%c0_12, %c0_13, %c0_14], %27 {strides = array<i32>} : memref<1x8x128xf32, #tpu.memory_space<vmem>>, vector<1x8x128xf32>,
    %c0_i32 = arith.constant 0 : i32
    %29 = arith.cmpi eq, %arg0, %c0_i32 : i32
    %30 = arith.extui %29 : i1 to i32
    %c0_i32_15 = arith.constant 0 : i32
    %31 = arith.cmpi ne, %30, %c0_i32_15 : i32
    scf.if %31 {
      %32 = tpu.iota {dimensions = array<i32: 0>} : vector<24x1xi32>
      %c24_i32 = arith.constant 24 : i32
      %33 = arith.muli %arg0, %c24_i32 : i32
      %34 = vector.broadcast %33 : i32 to vector<24x1xi32>
      %35 = arith.addi %32, %34 : vector<24x1xi32>
      %c20_i32 = arith.constant 20 : i32
      %36 = vector.broadcast %c20_i32 : i32 to vector<24x1xi32>
      %37 = arith.cmpi slt, %35, %36 : vector<24x1xi32>
      %cst_16 = arith.constant 0.000000e+00 : f32
      %38 = vector.broadcast %cst_16 : f32 to vector<24x1xf32>
      %39 = arith.select %37, %22, %38 : vector<24x1xi1>, vector<24x1xf32>
      %40 = vector.shape_cast %39 : vector<24x1xf32> to vector<1x24x1xf32>
      %cst_17 = arith.constant dense<0.000000e+00> : vector<1xf32>
      %41 = vector.multi_reduction <add>, %40, %cst_17 [1, 2] : vector<1x24x1xf32> to vector<1xf32>
      %42 = vector.shape_cast %41 : vector<1xf32> to vector<1x1x1xf32>
      %43 = vector.extract %42[0, 0, 0] : f32 from vector<1x1x1xf32>
      %44 = vector.broadcast %43 : f32 to vector<1x8x128xf32>
      %c0_18 = arith.constant 0 : index
      %c0_19 = arith.constant 0 : index
      %c0_20 = arith.constant 0 : index
      %45 = vector.load %arg5[%c0_18, %c0_19, %c0_20] : memref<1x8x128xf32, #tpu.memory_space<vmem>>, vector<1x8x128xf32>
      tpu.vector_store %arg5[%c0_18, %c0_19, %c0_20], %44 {strides = array<i32>} : memref<1x8x128xf32, #tpu.memory_space<vmem>>, vector<1x8x128xf32>,
    } else {
    }
    return
  }
  func.func @transform_0(%arg0: i32) -> (i32, i32) {
    %c0_i32 = arith.constant 0 : i32
    %c0_i32_0 = arith.constant 0 : i32
    %c0_i32_1 = arith.constant 0 : i32
    return %c0_i32, %c0_i32_0 : i32, i32
  }
  func.func @transform_1(%arg0: i32) -> (i32, i32) {
    %c0_i32 = arith.constant 0 : i32
    %c0_i32_0 = arith.constant 0 : i32
    return %arg0, %c0_i32 : i32, i32
  }
  func.func @transform_2(%arg0: i32) -> (i32, i32) {
    %c0_i32 = arith.constant 0 : i32
    %c0_i32_0 = arith.constant 0 : i32
    return %arg0, %c0_i32 : i32, i32
  }
  func.func @transform_3(%arg0: i32) -> (i32, i32) {
    %c0_i32 = arith.constant 0 : i32
    %c0_i32_0 = arith.constant 0 : i32
    return %arg0, %c0_i32 : i32, i32
  }
  func.func @transform_4(%arg0: i32) -> (i32, i32, i32) {
    %c0_i32 = arith.constant 0 : i32
    %c0_i32_0 = arith.constant 0 : i32
    %c0_i32_1 = arith.constant 0 : i32
    return %arg0, %c0_i32, %c0_i32_0 : i32, i32, i32
  }
}

</mosaic_0001>

<bundles_post_ra>
// kernel: tpu_custom_call.1
= control target key start
LH: loop header
LB: loop body
LE: loop exit
PB: predicated region body
PF: predicated region fallthrough
CT: control target
= control target key end

     0   :  { %10 = vsyncpa [#allocation4], 0  ;;  %s490_s0 = inlined_call_operand.<no memory space> [shape: f32[1,1], index: 0, kind: input, shape index: {}]   ;;  %s491_s1 = inlined_call_operand.hbm [shape: f32[20,32], index: 1, kind: input, shape index: {}]   ;;  %s492_s2 = inlined_call_operand.hbm [shape: f32[20,32], index: 2, kind: input, shape index: {}]   ;;  %s493_s3 = inlined_call_operand.hbm [shape: f32[20,32], index: 3, kind: input, shape index: {}]   ;;  %s494_s4 = inlined_call_operand.hbm [shape: f32[1,8,128], index: 4, kind: output, shape index: {}]  }
   0x1   :  { %11 = vsyncpa [#allocation7], 0 }
   0x2   :  { %12 = vsyncpa [#allocation5], 0  ;;  %s32_s17 = sshll.u32 %s492_s2, 4  ;;  %s389_s18 = smov [#allocation6]   ;;  %s33_s17 = int_to_ptr.hbm [resolvable:$true] %s32_s17 }
   0x3   :  { %s34_s19 = sshll.u32 %s389_s18, 4  ;;  %s19_s22 = sshll.u32 %s491_s1, 4  ;;  %s35_s19 = int_to_ptr.vmem [resolvable:$true] %s34_s19  ;;  %s20_s22 = int_to_ptr.hbm [resolvable:$true] %s19_s22 }
   0x4   :  { %s390_s23 = smov 128   ;;  %s391_s24 = smov 8  }
   0x5   :  { %40 = dma.hbm_to_vmem [thread:$0]  %s33_s17, 384, %s35_s19, [#allocation7], %s390_s23, %s390_s23, %s391_s24  }
   0x6   :  { %s392_s25 = smov [#allocation3]   ;;  %s45_s29 = sshll.u32 %s493_s3, 4  ;;  %s46_s29 = int_to_ptr.hbm [resolvable:$true] %s45_s29 }
   0x7   :  { %s21_s26 = sshll.u32 %s392_s25, 4  ;;  %s393_s2 = smov [#allocation8]   ;;  %s22_s26 = int_to_ptr.vmem [resolvable:$true] %s21_s26 }
   0x8   :  { %27 = dma.hbm_to_vmem [thread:$0]  %s20_s22, 384, %s22_s26, [#allocation4], %s390_s23, %s390_s23, %s391_s24  }
   0x9   :  { %s47_s30 = sshll.u32 %s393_s2, 4  ;;  %s48_s30 = int_to_ptr.vmem [resolvable:$true] %s47_s30 }
   0xa   :  { %53 = dma.hbm_to_vmem [thread:$0]  %s46_s29, 384, %s48_s30, [#allocation7], %s390_s23, %s390_s23, %s391_s24  }
   0xb   :  { %383 = dma.done.wait [#allocation4], 384  }
   0xc   :  { %384 = vsyncadd [#allocation4], 4294966912 }
   0xd   :  { %385 = dma.done.wait [#allocation7], 768  }
   0xe   :  { %386 = vsyncadd [#allocation7], 4294966528  ;;  %v68_v0 = vld [vmem:[#allocation3 + $0x10] sm:$0xff]  ;;  %v71_v1 = vld [vmem:[#allocation6 + $0x10] sm:$0xff]  ;;  %vm90_vm0 = vcmask 261120   ;;  %v452_v57 = vstv %s490_s0  ;;  %v216_v58 = vlaneseq  ;;  %vm195_vm14 = vcmask 7168  }
   0xf   :  { %v66_v2 = vld [vmem:[#allocation3] sm:$0xff]  ;;  %v77_v3 = vsub.f32 %v68_v0, %v71_v1  ;;  %v72_v4 = vld [vmem:[#allocation8] sm:$0xff]  ;;  %v69_v5 = vld [vmem:[#allocation6] sm:$0xff]  ;;  %s394_s0 = smov [#allocation9]   ;;  %s254_s8 = sshll.u32 %s494_s4, 4  ;;  %s255_s8 = int_to_ptr.hbm [resolvable:$true] %s254_s8 }
  0x10   :  { %v74_v6 = vld [vmem:[#allocation8 + $0x10] sm:$0xff]  ;;  %v81_v7 = vsub.f32 %v66_v2, %v72_v4  ;;  %v75_v8 = vsub.f32 %v66_v2, %v69_v5  ;;  %v67_v10 = vld [vmem:[#allocation3 + $0x8] sm:$0xff]  ;;  %v73_v11 = vld [vmem:[#allocation8 + $0x8] sm:$0xff]  ;;  %s252_s5 = sshll.u32 %s394_s0, 4  ;;  %s253_s5 = int_to_ptr.vmem [resolvable:$true] %s252_s5 }
  0x11   :  { %v83_v9 = vsub.f32 %v68_v0, %v74_v6  ;;  %v70_v12 = vld [vmem:[#allocation6 + $0x8] sm:$0xff]  ;;  %v80_v13 = vadd.f32 1e-06, %v77_v3  ;;  %v82_v14 = vsub.f32 %v67_v10, %v73_v11 }
  0x12   :  { %v76_v15 = vsub.f32 %v67_v10, %v70_v12  ;;  %v84_v16 = vadd.f32 1e-06, %v81_v7  ;;  %v78_v17 = vadd.f32 1e-06, %v75_v8  ;;  %v217_v8 = vshrl.u32 %v216_v58, 7 }
  0x13   :  { %v89_v18 = vmul.f32 %v80_v13, %v80_v13  ;;  %v86_v19 = vadd.f32 1e-06, %v83_v9  ;;  %v85_v22 = vadd.f32 1e-06, %v82_v14 }
  0x14   :  { %v136_v20 = vmul.f32 %v84_v16, %v84_v16  ;;  %v87_v21 = vmul.f32 %v78_v17, %v78_v17  ;;  %v79_v23 = vadd.f32 1e-06, %v76_v15 }
  0x15   :  { %v97_v24 = vsel %vm90_vm0, %v89_v18, 0.0  ;;  %v138_v27 = vmul.f32 %v86_v19, %v86_v19  ;;  %v137_v28 = vmul.f32 %v85_v22, %v85_v22  ;;  %v219_v22 = vadd.s32 16, %v217_v8 }
  0x16   :  { %98 = vadd.xlane.f32.xlu2 %v97_v24  ;;  %v139_v25 = vsel %vm90_vm0, %v136_v20, 0.0  ;;  %v91_v26 = vsel %vm90_vm0, %v87_v21, 0.0  ;;  %v88_v29 = vmul.f32 %v79_v23, %v79_v23 }
  0x17   :  { %140 = vadd.xlane.f32.xlu1 %v139_v25  ;;  %92 = vadd.xlane.f32.xlu0 %v91_v26  ;;  %v145_v30 = vsel %vm90_vm0, %v138_v27, 0.0  ;;  %v142_v31 = vsel %vm90_vm0, %v137_v28, 0.0  ;;  %vm227_vm13 = vcmp.lt.s32.totalorder %v219_v22, 20 }
  0x18   :  { %v94_v32 = vsel %vm90_vm0, %v88_v29, 0.0 }
  0x1e   :  { %146 = vadd.xlane.f32.xlu2 %v145_v30 }
  0x1f   :  { %143 = vadd.xlane.f32.xlu1 %v142_v31  ;;  %95 = vadd.xlane.f32.xlu0 %v94_v32 }
  0x89   :  { %v435_v33 = vpop.xlane.xlu2 %98 }
  0x8a   :  { %275 = vrsqrt.f32 %v435_v33  ;;  %v141_v34 = vpop.xlane.xlu1 %140  ;;  %v93_v35 = vpop.xlane.xlu0 %92  ;;  %vm131_vm3 = vcmp.eq.f32.partialorder %v435_v33, inf  ;;  %vm133_vm6 = vcmp.eq.f32.partialorder %v435_v33, 0.0  ;;  %v134_v21 = vand.u32 2147483648, %v435_v33 }
  0x8b   :  { %277 = vrsqrt.f32 %v141_v34  ;;  %vm107_vm1 = vcmp.eq.f32.partialorder %v93_v35, inf  ;;  %vm109_vm2 = vcmp.eq.f32.partialorder %v93_v35, 0.0  ;;  %v110_v4 = vand.u32 2147483648, %v93_v35 }
  0x8c   :  { %279 = vrsqrt.f32 %v93_v35  ;;  %vm155_vm4 = vcmp.eq.f32.partialorder %v141_v34, inf  ;;  %vm157_vm5 = vcmp.eq.f32.partialorder %v141_v34, 0.0  ;;  %v158_v11 = vand.u32 2147483648, %v141_v34 }
  0x90   :  { %v276_v36 = vpop.eup %275 }
  0x91   :  { %v278_v37 = vpop.eup %277  ;;  %v125_v38 = vmul.f32 %v276_v36, %v435_v33  ;;  %v439_v39 = vpop.xlane.xlu2 %146 }
  0x92   :  { %v280_v40 = vpop.eup %279  ;;  %v149_v41 = vmul.f32 %v278_v37, %v141_v34  ;;  %281 = vrsqrt.f32 %v439_v39  ;;  %v442_v42 = vpop.xlane.xlu1 %143  ;;  %vm179_vm7 = vcmp.eq.f32.partialorder %v439_v39, inf  ;;  %v182_v23 = vand.u32 2147483648, %v439_v39 }
  0x93   :  { %v444_v43 = vpop.xlane.xlu0 %95  ;;  %v126_v44 = vmul.f32 %v276_v36, %v125_v38  ;;  %v101_v45 = vmul.f32 %v280_v40, %v93_v35  ;;  %283 = vrsqrt.f32 %v442_v42  ;;  %vm167_vm10 = vcmp.eq.f32.partialorder %v442_v42, inf }
  0x94   :  { %v150_v46 = vmul.f32 %v278_v37, %v149_v41  ;;  %285 = vrsqrt.f32 %v444_v43  ;;  %vm119_vm8 = vcmp.eq.f32.partialorder %v444_v43, inf  ;;  %vm121_vm9 = vcmp.eq.f32.partialorder %v444_v43, 0.0 }
  0x95   :  { %v127_v47 = vmul.f32 0.5, %v126_v44  ;;  %v102_v48 = vmul.f32 %v280_v40, %v101_v45  ;;  %v122_v30 = vand.u32 2147483648, %v444_v43  ;;  %v170_v32 = vand.u32 2147483648, %v442_v42 }
  0x96   :  { %v151_v49 = vmul.f32 0.5, %v150_v46  ;;  %vm181_vm11 = vcmp.eq.f32.partialorder %v439_v39, 0.0  ;;  %vm169_vm12 = vcmp.eq.f32.partialorder %v442_v42, 0.0 }
  0x97   :  { %v128_v50 = vsub.f32 1.5, %v127_v47  ;;  %v103_v51 = vmul.f32 0.5, %v102_v48 }
  0x98   :  { %v282_v52 = vpop.eup %281  ;;  %v152_v53 = vsub.f32 1.5, %v151_v49 }
  0x99   :  { %v284_v54 = vpop.eup %283  ;;  %v104_v55 = vsub.f32 1.5, %v103_v51  ;;  %v173_v56 = vmul.f32 %v282_v52, %v439_v39  ;;  %v129_v62 = vmul.f32 %v276_v36, %v128_v50 }
  0x9a   :  { %v286_v59 = vpop.eup %285  ;;  %v153_v60 = vmul.f32 %v278_v37, %v152_v53  ;;  %v161_v61 = vmul.f32 %v284_v54, %v442_v42 }
  0x9b   :  { %v105_v63 = vmul.f32 %v280_v40, %v104_v55  ;;  %v174_v0 = vmul.f32 %v282_v52, %v173_v56  ;;  %v113_v1 = vmul.f32 %v286_v59, %v444_v43  ;;  %v130_v12 = vmul.f32 %v129_v62, %v435_v33 }
  0x9c   :  { %v154_v2 = vmul.f32 %v153_v60, %v141_v34  ;;  %v162_v3 = vmul.f32 %v284_v54, %v161_v61 }
  0x9d   :  { %v106_v5 = vmul.f32 %v105_v63, %v93_v35  ;;  %v175_v6 = vmul.f32 0.5, %v174_v0  ;;  %v114_v7 = vmul.f32 %v286_v59, %v113_v1  ;;  %v132_v27 = vsel %vm131_vm3, %v435_v33, %v130_v12 }
  0x9e   :  { %v163_v9 = vmul.f32 0.5, %v162_v3  ;;  %v156_v10 = vsel %vm155_vm4, %v141_v34, %v154_v2 }
  0x9f   :  { %v176_v13 = vsub.f32 1.5, %v175_v6  ;;  %v115_v14 = vmul.f32 0.5, %v114_v7  ;;  %v108_v15 = vsel %vm107_vm1, %v93_v35, %v106_v5  ;;  %v159_v18 = vsel %vm157_vm5, %v158_v11, %v156_v10 }
  0xa0   :  { %v164_v16 = vsub.f32 1.5, %v163_v9  ;;  %v111_v17 = vsel %vm109_vm2, %v110_v4, %v108_v15  ;;  %v135_v35 = vsel %vm133_vm6, %v134_v21, %v132_v27 }
  0xa1   :  { %v177_v19 = vmul.f32 %v282_v52, %v176_v13  ;;  %v116_v20 = vsub.f32 1.5, %v115_v14  ;;  %v185_v28 = vsub.f32 %v111_v17, %v159_v18 }
  0xa2   :  { %v165_v24 = vmul.f32 %v284_v54, %v164_v16 }
  0xa3   :  { %v178_v25 = vmul.f32 %v177_v19, %v439_v39  ;;  %v117_v26 = vmul.f32 %v286_v59, %v116_v20  ;;  %v189_v44 = vadd.f32 %v452_v57, %v185_v28 }
  0xa4   :  { %v166_v29 = vmul.f32 %v165_v24, %v442_v42 }
  0xa5   :  { %v118_v31 = vmul.f32 %v117_v26, %v444_v43  ;;  %v180_v34 = vsel %vm179_vm7, %v439_v39, %v178_v25  ;;  %v192_v47 = vmax.f32 %v189_v44, 0.0 }
  0xa6   :  { %v168_v36 = vsel %vm167_vm10, %v442_v42, %v166_v29  ;;  %v183_v37 = vsel %vm181_vm11, %v182_v23, %v180_v34 }
  0xa7   :  { %v120_v38 = vsel %vm119_vm8, %v444_v43, %v118_v31  ;;  %v171_v40 = vsel %vm169_vm12, %v170_v32, %v168_v36  ;;  %v187_v41 = vsub.f32 %v135_v35, %v183_v37  ;;  %v196_v50 = vsel %vm195_vm14, %v192_v47, 0.0 }
  0xa8   :  { %v123_v45 = vsel %vm121_vm9, %v122_v30, %v120_v38 }
  0xa9   :  { %v186_v46 = vsub.f32 %v123_v45, %v171_v40  ;;  %v191_v39 = vadd.f32 %v452_v57, %v187_v41 }
  0xab   :  { %v190_v33 = vadd.f32 %v452_v57, %v186_v46  ;;  %v194_v48 = vmax.f32 %v191_v39, 0.0 }
  0xad   :  { %v193_v42 = vmax.f32 %v190_v33, 0.0  ;;  %v230_v49 = vsel %vm227_vm13, %v194_v48, 0.0  ;;  %v199_v53 = vsel %vm195_vm14, %v194_v48, 0.0 }
  0xae   :  { %v234_v52 = vsel %vm195_vm14, %v230_v49, 0.0 }
  0xaf   :  { %v197_v51 = vsel %vm195_vm14, %v193_v42, 0.0 }
  0xb0   :  { %v198_v43 = vadd.f32 %v197_v51, %v196_v50 }
  0xb2   :  { %v235_v54 = vadd.f32 %v234_v52, %v198_v43  ;;  %v200_v55 = vadd.f32 %v199_v53, %v198_v43 }
  0xb4   :  { %236 = vadd.xlane.f32.xlu1 %v235_v54  ;;  %201 = vadd.xlane.f32.xlu0 %v200_v55 }
 0x127   :  { %v237_v56 = vpop.xlane.xlu1 %236  ;;  %v202_v58 = vpop.xlane.xlu0 %201 }
 0x128   :  { %v238_v59 = vrot.slane %v237_v56, 4  ;;  %v203_v60 = vrot.slane %v202_v58, 4 }
 0x12a   :  { %v239_v61 = vadd.f32 %v238_v59, %v237_v56  ;;  %v204_v57 = vadd.f32 %v203_v60, %v202_v58 }
 0x12c   :  { %v240_v62 = vrot.slane %v239_v61, 2  ;;  %v205_v63 = vrot.slane %v204_v57, 2 }
 0x12e   :  { %v241_v0 = vadd.f32 %v240_v62, %v239_v61  ;;  %v206_v1 = vadd.f32 %v205_v63, %v204_v57 }
 0x130   :  { %v207_v2 = vrot.slane %v206_v1, 1  ;;  %v242_v3 = vrot.slane %v241_v0, 1 }
 0x132   :  { %v208_v4 = vadd.f32 %v207_v2, %v206_v1  ;;  %v243_v5 = vadd.f32 %v242_v3, %v241_v0 }
 0x134   :  { %265 = vpush %v208_v4 }
 0x135   :  { %267 = vpush %v243_v5 }
 0x165   :  { %s266_s9 = spop %265 }
 0x166   :  { %s268_s10 = spop %267 }
 0x167   :  { %v245_v6 = vstv %s268_s10 }
 0x168   :  { %246 = vst [vmem:[#allocation9] sm:$0xff] %v245_v6 }
 0x169   :  { %257 = dma.vmem_to_hbm [thread:$0]  %s253_s5, 128, %s255_s8, [#allocation5]  }
 0x16a   :  { %387 = dma.done.wait [#allocation5], 128  }
 0x16b   :  { %388 = vsyncadd [#allocation5], 4294967168 }
 0x16c   :  { %262 = vsyncpa [#allocation4], 1 }
 0x16d   :  { %263 = vsyncpa [#allocation7], 1 }
 0x16e   :  { %264 = vsyncpa [#allocation5], 1 }

</bundles_post_ra>
